<compile_context>
chip_gen: v7x
topology: tpu7x:2x2x1
jax: 0.10.0
libtpu: 0.0.40
codegen_flags: <defaults>
</compile_context>

<pallas_src>
import jax
import jax.numpy as jnp
from jax.experimental import pallas as pl
from jax.experimental.pallas import tpu as pltpu


def dqn_kernel(x_ref, w1_ref, b1_ref, w2_ref, b2_ref, w3_ref, b3_ref,
               w4_ref, b4_ref, o_ref):
    # Whole 4-layer MLP (3x matmul+ReLU, 1x matmul) on one batch tile.
    # Matmuls run in the weight dtype (f32 or bf16) with f32 accumulation;
    # bias add / ReLU stay f32 (v5e VPU has no bf16).
    wdt = w1_ref.dtype
    h = jnp.dot(x_ref[...], w1_ref[...], preferred_element_type=jnp.float32)
    h = jnp.maximum(h + b1_ref[...], 0.0)

    h = jnp.dot(h.astype(wdt), w2_ref[...], preferred_element_type=jnp.float32)
    h = jnp.maximum(h + b2_ref[...], 0.0)

    h = jnp.dot(h.astype(wdt), w3_ref[...], preferred_element_type=jnp.float32)
    h = jnp.maximum(h + b3_ref[...], 0.0)

    h = jnp.dot(h.astype(wdt), w4_ref[...], preferred_element_type=jnp.float32)
    # Output block last dim == full array dim (out_dim): lane-narrow but
    # correct, and writes out_dim floats/row instead of 128.
    o_ref[...] = (h + b4_ref[...]).astype(o_ref.dtype)


def _round_up(x, m):
    return ((x + m - 1) // m) * m


def _choose_batch_tile(B, tb_max):
    """Pick (tile, padded_batch): multiple of 8, <= tb_max, and >= 2 grid steps
    whenever the batch allows it (v7x has 2 TensorCores per chip)."""
    b8 = _round_up(B, 8)
    if b8 <= 8:
        return b8, b8
    tb = min(tb_max, _round_up(-(-b8 // 2), 8))  # cap at ~half the batch
    b_pad = _round_up(b8, tb)
    return tb, b_pad


def dqn_forward(x, params, *, batch_tile=1024, use_bf16=False):
    """x: (B, input_dim) f32. params: w1..w4 (in,out) f32, b1..b4 (1,out) f32."""
    B, in_dim = x.shape
    out_dim = params["w4"].shape[1]

    tb, b_pad = _choose_batch_tile(B, batch_tile)
    if b_pad != B:
        # Only a ragged last tile / tiny batch pays this; jit this wrapper so
        # XLA fuses the pad with the surrounding graph.
        x = jnp.pad(x, ((0, b_pad - B), (0, 0)))

    wdt = jnp.bfloat16 if use_bf16 else jnp.float32
    x = x.astype(wdt)
    w1, w2, w3, w4 = (params[f"w{i}"].astype(wdt) for i in range(1, 5))
    b1, b2, b3, b4 = (params[f"b{i}"].astype(jnp.float32) for i in range(1, 5))
    weights = (w1, b1, w2, b2, w3, b3, w4, b4)

    grid = (b_pad // tb,)

    def act_map(i):
        return (i, 0)

    def const_map(i):
        return (0, 0)

    in_specs = [pl.BlockSpec((tb, in_dim), act_map)]
    in_specs += [pl.BlockSpec(w.shape, const_map) for w in weights]

    esize = jnp.dtype(wdt).itemsize
    flops = 2 * b_pad * (in_dim * 64 + 64 * 32 + 32 * 8 + 8 * out_dim)
    bytes_accessed = (b_pad * in_dim * esize
                      + sum(int(w.size) * w.dtype.itemsize for w in weights)
                      + b_pad * out_dim * 4)

    out = pl.pallas_call(
        dqn_kernel,
        out_shape=jax.ShapeDtypeStruct((b_pad, out_dim), jnp.float32),
        grid=grid,
        in_specs=in_specs,
        out_specs=pl.BlockSpec((tb, out_dim), act_map),
        compiler_params=pltpu.CompilerParams(
            dimension_semantics=("parallel",)),
        cost_estimate=pl.CostEstimate(
            flops=flops, transcendentals=0, bytes_accessed=bytes_accessed),
    )(x, *weights)

    return out[:B]


def init_params(key, input_dim, output_dim):
    dims = [(input_dim, 64), (64, 32), (32, 8), (8, output_dim)]
    params = {}
    for i, (fan_in, fan_out) in enumerate(dims, start=1):
        key, kw, kb = jax.random.split(key, 3)
        bound = 1.0 / jnp.sqrt(jnp.float32(fan_in))  # matches nn.Linear default
        params[f"w{i}"] = jax.random.uniform(
            kw, (fan_in, fan_out), jnp.float32, -bound, bound)
        params[f"b{i}"] = jax.random.uniform(
            kb, (1, fan_out), jnp.float32, -bound, bound)
    return params


def dqn_reference(x, params):
    h = jnp.maximum(x @ params["w1"] + params["b1"], 0.0)
    h = jnp.maximum(h @ params["w2"] + params["b2"], 0.0)
    h = jnp.maximum(h @ params["w3"] + params["b3"], 0.0)
    return h @ params["w4"] + params["b4"]


if __name__ == "__main__":
    key = jax.random.PRNGKey(0)
    key, kx, kx2 = jax.random.split(key, 3)

    batch, input_dim, output_dim = 2, 16, 4
    params = init_params(key, input_dim, output_dim)

    fwd = jax.jit(dqn_forward, static_argnames=("batch_tile", "use_bf16"))

    # Small-batch path (single grid step, tile rounded to 8 sublanes).
    x = jax.random.normal(kx, (batch, input_dim), jnp.float32)
    out = fwd(x, params)
    jax.block_until_ready(out)
    ref = dqn_reference(x, params)
    assert out.shape == (batch, output_dim)
    assert jnp.allclose(out, ref, atol=1e-5, rtol=1e-5)

    # Gridded path: 512 rows -> 2 x 256-row tiles (>=2 steps for v7x's 2 TCs),
    # weights VMEM-resident across steps, un-padded lane-narrow output.
    x_big = jax.random.normal(kx2, (512, input_dim), jnp.float32)
    out_big = fwd(x_big, params)
    jax.block_until_ready(out_big)
    ref_big = dqn_reference(x_big, params)
    assert out_big.shape == (512, output_dim)
    assert jnp.allclose(out_big, ref_big, atol=1e-5, rtol=1e-5)

    # Optional bf16 MXU path (f32 accumulation / bias / ReLU; f32 output).
    out_bf16 = fwd(x_big, params, use_bf16=True)
    jax.block_until_ready(out_bf16)
    assert jnp.allclose(out_bf16, ref_big, atol=1e-1, rtol=5e-2)

    print("KERNEL_OK")
</pallas_src>

<mosaic_0001>
module attributes {stable_mosaic.version = 11 : i64} {
  func.func @dqn_kernel(%arg0: i32, %arg1: memref<8x16xf32, #tpu.memory_space<vmem>>, %arg2: memref<16x64xf32, #tpu.memory_space<vmem>>, %arg3: memref<1x64xf32, #tpu.memory_space<vmem>>, %arg4: memref<64x32xf32, #tpu.memory_space<vmem>>, %arg5: memref<1x32xf32, #tpu.memory_space<vmem>>, %arg6: memref<32x8xf32, #tpu.memory_space<vmem>>, %arg7: memref<1x8xf32, #tpu.memory_space<vmem>>, %arg8: memref<8x4xf32, #tpu.memory_space<vmem>>, %arg9: memref<1x4xf32, #tpu.memory_space<vmem>>, %arg10: memref<8x4xf32, #tpu.memory_space<vmem>>) attributes {dimension_semantics = [#tpu.dimension_semantics<parallel>], iteration_bounds = array<i64: 1>, scalar_prefetch = 0 : i64, scratch_operands = 0 : i64, tpu.core_type = #tpu.core_type<tc>, window_params = [{transform_indices = @transform_0, window_bounds = array<i64: 8, 16>}, {pipeline_mode = #tpu.pipeline_mode<synchronous>, transform_indices = @transform_1, window_bounds = array<i64: 16, 64>}, {pipeline_mode = #tpu.pipeline_mode<synchronous>, transform_indices = @transform_2, window_bounds = array<i64: 1, 64>}, {pipeline_mode = #tpu.pipeline_mode<synchronous>, transform_indices = @transform_3, window_bounds = array<i64: 64, 32>}, {pipeline_mode = #tpu.pipeline_mode<synchronous>, transform_indices = @transform_4, window_bounds = array<i64: 1, 32>}, {pipeline_mode = #tpu.pipeline_mode<synchronous>, transform_indices = @transform_5, window_bounds = array<i64: 32, 8>}, {pipeline_mode = #tpu.pipeline_mode<synchronous>, transform_indices = @transform_6, window_bounds = array<i64: 1, 8>}, {pipeline_mode = #tpu.pipeline_mode<synchronous>, transform_indices = @transform_7, window_bounds = array<i64: 8, 4>}, {pipeline_mode = #tpu.pipeline_mode<synchronous>, transform_indices = @transform_8, window_bounds = array<i64: 1, 4>}, {transform_indices = @transform_9, window_bounds = array<i64: 8, 4>}]} {
    %c0 = arith.constant 0 : index
    %c0_0 = arith.constant 0 : index
    %0 = vector.load %arg1[%c0, %c0_0] : memref<8x16xf32, #tpu.memory_space<vmem>>, vector<8x16xf32>
    %c0_1 = arith.constant 0 : index
    %c0_2 = arith.constant 0 : index
    %1 = vector.load %arg2[%c0_1, %c0_2] : memref<16x64xf32, #tpu.memory_space<vmem>>, vector<16x64xf32>
    %cst = arith.constant dense<0.000000e+00> : vector<8x64xf32>
    %2 = tpu.matmul %0, %1, %cst {dimension_numbers = #tpu.dot_dimension_numbers<[1], [0], [0], [1], [0, 0, 1, 1], [], []>} : vector<8x16xf32>, vector<16x64xf32>, vector<8x64xf32> -> vector<8x64xf32>
    %c0_3 = arith.constant 0 : index
    %c0_4 = arith.constant 0 : index
    %3 = vector.load %arg3[%c0_3, %c0_4] : memref<1x64xf32, #tpu.memory_space<vmem>>, vector<1x64xf32>
    %4 = vector.broadcast %3 : vector<1x64xf32> to vector<8x64xf32>
    %5 = arith.addf %2, %4 : vector<8x64xf32>
    %cst_5 = arith.constant 0.000000e+00 : f32
    %6 = vector.broadcast %cst_5 : f32 to vector<8x64xf32>
    %7 = arith.maximumf %5, %6 : vector<8x64xf32>
    %c0_6 = arith.constant 0 : index
    %c0_7 = arith.constant 0 : index
    %8 = vector.load %arg4[%c0_6, %c0_7] : memref<64x32xf32, #tpu.memory_space<vmem>>, vector<64x32xf32>
    %cst_8 = arith.constant dense<0.000000e+00> : vector<8x32xf32>
    %9 = tpu.matmul %7, %8, %cst_8 {dimension_numbers = #tpu.dot_dimension_numbers<[1], [0], [0], [1], [0, 0, 1, 1], [], []>} : vector<8x64xf32>, vector<64x32xf32>, vector<8x32xf32> -> vector<8x32xf32>
    %c0_9 = arith.constant 0 : index
    %c0_10 = arith.constant 0 : index
    %10 = vector.load %arg5[%c0_9, %c0_10] : memref<1x32xf32, #tpu.memory_space<vmem>>, vector<1x32xf32>
    %11 = vector.broadcast %10 : vector<1x32xf32> to vector<8x32xf32>
    %12 = arith.addf %9, %11 : vector<8x32xf32>
    %cst_11 = arith.constant 0.000000e+00 : f32
    %13 = vector.broadcast %cst_11 : f32 to vector<8x32xf32>
    %14 = arith.maximumf %12, %13 : vector<8x32xf32>
    %c0_12 = arith.constant 0 : index
    %c0_13 = arith.constant 0 : index
    %15 = vector.load %arg6[%c0_12, %c0_13] : memref<32x8xf32, #tpu.memory_space<vmem>>, vector<32x8xf32>
    %cst_14 = arith.constant dense<0.000000e+00> : vector<8x8xf32>
    %16 = tpu.matmul %14, %15, %cst_14 {dimension_numbers = #tpu.dot_dimension_numbers<[1], [0], [0], [1], [0, 0, 1, 1], [], []>} : vector<8x32xf32>, vector<32x8xf32>, vector<8x8xf32> -> vector<8x8xf32>
    %c0_15 = arith.constant 0 : index
    %c0_16 = arith.constant 0 : index
    %17 = vector.load %arg7[%c0_15, %c0_16] : memref<1x8xf32, #tpu.memory_space<vmem>>, vector<1x8xf32>
    %18 = vector.broadcast %17 : vector<1x8xf32> to vector<8x8xf32>
    %19 = arith.addf %16, %18 : vector<8x8xf32>
    %cst_17 = arith.constant 0.000000e+00 : f32
    %20 = vector.broadcast %cst_17 : f32 to vector<8x8xf32>
    %21 = arith.maximumf %19, %20 : vector<8x8xf32>
    %c0_18 = arith.constant 0 : index
    %c0_19 = arith.constant 0 : index
    %22 = vector.load %arg8[%c0_18, %c0_19] : memref<8x4xf32, #tpu.memory_space<vmem>>, vector<8x4xf32>
    %cst_20 = arith.constant dense<0.000000e+00> : vector<8x4xf32>
    %23 = tpu.matmul %21, %22, %cst_20 {dimension_numbers = #tpu.dot_dimension_numbers<[1], [0], [0], [1], [0, 0, 1, 1], [], []>} : vector<8x8xf32>, vector<8x4xf32>, vector<8x4xf32> -> vector<8x4xf32>
    %c0_21 = arith.constant 0 : index
    %c0_22 = arith.constant 0 : index
    %24 = vector.load %arg9[%c0_21, %c0_22] : memref<1x4xf32, #tpu.memory_space<vmem>>, vector<1x4xf32>
    %25 = vector.broadcast %24 : vector<1x4xf32> to vector<8x4xf32>
    %26 = arith.addf %23, %25 : vector<8x4xf32>
    %c0_23 = arith.constant 0 : index
    %c0_24 = arith.constant 0 : index
    %27 = vector.load %arg10[%c0_23, %c0_24] : memref<8x4xf32, #tpu.memory_space<vmem>>, vector<8x4xf32>
    tpu.vector_store %arg10[%c0_23, %c0_24], %26 {strides = array<i32>} : memref<8x4xf32, #tpu.memory_space<vmem>>, vector<8x4xf32>,
    return
  }
  func.func @transform_0(%arg0: i32) -> (i32, i32) {
    %c0_i32 = arith.constant 0 : i32
    %c0_i32_0 = arith.constant 0 : i32
    return %arg0, %c0_i32 : i32, i32
  }
  func.func @transform_1(%arg0: i32) -> (i32, i32) {
    %c0_i32 = arith.constant 0 : i32
    %c0_i32_0 = arith.constant 0 : i32
    %c0_i32_1 = arith.constant 0 : i32
    return %c0_i32, %c0_i32_0 : i32, i32
  }
  func.func @transform_2(%arg0: i32) -> (i32, i32) {
    %c0_i32 = arith.constant 0 : i32
    %c0_i32_0 = arith.constant 0 : i32
    %c0_i32_1 = arith.constant 0 : i32
    return %c0_i32, %c0_i32_0 : i32, i32
  }
  func.func @transform_3(%arg0: i32) -> (i32, i32) {
    %c0_i32 = arith.constant 0 : i32
    %c0_i32_0 = arith.constant 0 : i32
    %c0_i32_1 = arith.constant 0 : i32
    return %c0_i32, %c0_i32_0 : i32, i32
  }
  func.func @transform_4(%arg0: i32) -> (i32, i32) {
    %c0_i32 = arith.constant 0 : i32
    %c0_i32_0 = arith.constant 0 : i32
    %c0_i32_1 = arith.constant 0 : i32
    return %c0_i32, %c0_i32_0 : i32, i32
  }
  func.func @transform_5(%arg0: i32) -> (i32, i32) {
    %c0_i32 = arith.constant 0 : i32
    %c0_i32_0 = arith.constant 0 : i32
    %c0_i32_1 = arith.constant 0 : i32
    return %c0_i32, %c0_i32_0 : i32, i32
  }
  func.func @transform_6(%arg0: i32) -> (i32, i32) {
    %c0_i32 = arith.constant 0 : i32
    %c0_i32_0 = arith.constant 0 : i32
    %c0_i32_1 = arith.constant 0 : i32
    return %c0_i32, %c0_i32_0 : i32, i32
  }
  func.func @transform_7(%arg0: i32) -> (i32, i32) {
    %c0_i32 = arith.constant 0 : i32
    %c0_i32_0 = arith.constant 0 : i32
    %c0_i32_1 = arith.constant 0 : i32
    return %c0_i32, %c0_i32_0 : i32, i32
  }
  func.func @transform_8(%arg0: i32) -> (i32, i32) {
    %c0_i32 = arith.constant 0 : i32
    %c0_i32_0 = arith.constant 0 : i32
    %c0_i32_1 = arith.constant 0 : i32
    return %c0_i32, %c0_i32_0 : i32, i32
  }
  func.func @transform_9(%arg0: i32) -> (i32, i32) {
    %c0_i32 = arith.constant 0 : i32
    %c0_i32_0 = arith.constant 0 : i32
    return %arg0, %c0_i32 : i32, i32
  }
}

</mosaic_0001>

<bundles_post_ra>
// kernel: dqn_forward.1
= control target key start
LH: loop header
LB: loop body
LE: loop exit
PB: predicated region body
PF: predicated region fallthrough
CT: control target
= control target key end

     0   :  { %v474_v0 = vmov 0.0|0.0   ;;  %vm475_vm0 = vmmov 0   ;;  %v476_v3 = vmov 0.0   ;;  %vm42_vm1 = vcmask 130048   ;;  %s594_s1 = inlined_call_operand.vmem [shape: f32[16,64], index: 1, kind: input, shape index: {}]   ;;  %s595_s3 = inlined_call_operand.vmem [shape: f32[64,32], index: 3, kind: input, shape index: {}]   ;;  %s596_s0 = inlined_call_operand.vmem [shape: f32[8,16], index: 0, kind: input, shape index: {}]   ;;  %s597_s5 = inlined_call_operand.vmem [shape: f32[32,8], index: 5, kind: input, shape index: {}]   ;;  %s598_s2 = inlined_call_operand.vmem [shape: f32[1,64], index: 2, kind: input, shape index: {}]   ;;  %s599_s4 = inlined_call_operand.vmem [shape: f32[1,32], index: 4, kind: input, shape index: {}]   ;;  %s600_s7 = inlined_call_operand.vmem [shape: f32[8,4], index: 7, kind: input, shape index: {}]   ;;  %s601_s6 = inlined_call_operand.vmem [shape: f32[1,8], index: 6, kind: input, shape index: {}]   ;;  %s602_s8 = inlined_call_operand.vmem [shape: f32[1,4], index: 8, kind: input, shape index: {}]   ;;  %s603_s9 = inlined_call_operand.vmem [shape: f32[8,4], index: 9, kind: output, shape index: {}]  }
   0x1   :  { %450 = vmatprep.subr.bf16.mxu0 %v474_v0  ;;  %v33_v1 = vld [vmem:[%s594_s1] sm:$0xff]  ;;  %v34_v2 = vld [vmem:[%s594_s1 + $0x8] sm:$0xff]  ;;  %412 = vmatprep.mubr.msk.f32.mxu0 %vm475_vm0, %v476_v3  ;;  %v119_v7 = vld [vmem:[%s595_s3 + $0x10] sm:$0xff]  ;;  %vm132_vm2 = vcmask 523264   ;;  %vm218_vm3 = vcmask 261120   ;;  %vm301_vm4 = vcmask 64512  }
   0x2   :  { %v451_v4 = vpack.c.bf16 %v34_v2, %v33_v1  ;;  %453 = vmatprep.subr.bf16.mxu1 %v474_v0  ;;  %v117_v5 = vld [vmem:[%s595_s3] sm:$0xff]  ;;  %v118_v6 = vld [vmem:[%s595_s3 + $0x8] sm:$0xff]  ;;  %431 = vmatprep.mubr.msk.f32.mxu1 %vm475_vm0, %v476_v3  ;;  %v120_v9 = vld [vmem:[%s595_s3 + $0x18] sm:$0xff]  ;;  %vm375_vm5 = vcmask 31744  }
   0x3   :  { %v454_v8 = vpack.c.bf16 %v118_v6, %v117_v5  ;;  %v32_v10 = vld [vmem:[%s596_s0] sm:$0xff]  ;;  %v457_v11 = vpack.c.bf16 %v120_v9, %v119_v7  ;;  %v122_v13 = vld [vmem:[%s595_s3 + $0x28] sm:$0xff]  ;;  %v123_v15 = vld [vmem:[%s595_s3 + $0x30] sm:$0xff] }
   0x4   :  { %452 = vmatpush3.bf16.msra.mxu0 %v451_v4  ;;  %v121_v12 = vld [vmem:[%s595_s3 + $0x20] sm:$0xff]  ;;  %v124_v16 = vld [vmem:[%s595_s3 + $0x38] sm:$0xff]  ;;  %v208_v19 = vld [vmem:[%s597_s5 + $0x8] sm:$0xff] }
   0x5   :  { %455 = vmatpush3.bf16.msra.mxu1 %v454_v8  ;;  %465 = vmatprep.subr.bf16.mxu0 %v474_v0  ;;  %v460_v14 = vpack.c.bf16 %v122_v13, %v121_v12  ;;  %v463_v17 = vpack.c.bf16 %v124_v16, %v123_v15  ;;  %v207_v18 = vld [vmem:[%s597_s5] sm:$0xff]  ;;  %v209_v26 = vld [vmem:[%s597_s5 + $0x10] sm:$0xff]  ;;  %v210_v27 = vld [vmem:[%s597_s5 + $0x18] sm:$0xff] }
   0x6   :  { %456 = vmatprep.subr.bf16.mxu1 %v474_v0  ;;  %v466_v20 = vpack.c.bf16 %v208_v19, %v207_v18  ;;  %v381_v21 = vld [vmem:[%s598_s2] ss:$0 sm:$0xff]  ;;  %v469_v28 = vpack.c.bf16 %v210_v27, %v209_v26 }
   0x7   :  { %413 = vmatmul.mubr.msk.f32.vlgmr.msra.gmra.mrb[0].mxu0 %vm42_vm1, %v32_v10  ;;  %v383_v29 = vld [vmem:[%s599_s4] ss:$0 sm:$0xff] }
   0x8   :  { %442 = vmatprep.mubr.msk.f32.mxu0 %vm475_vm0, %v476_v3  ;;  %467 = vmatpush3.bf16.msra.mxu0 %v466_v20  ;;  %v293_v34 = vld [vmem:[%s600_s7] sm:$0xff] }
   0x9   :  { %458 = vmatpush3.bf16.msra.mxu1 %v457_v11  ;;  %468 = vmatprep.subr.bf16.mxu0 %v474_v0  ;;  %v385_v35 = vld [vmem:[%s601_s6] ss:$0 sm:$0xff] }
   0xa   :  { %459 = vmatprep.subr.bf16.mxu1 %v474_v0  ;;  %v387_v40 = vld [vmem:[%s602_s8] ss:$0 sm:$0xff] }
   0xc   :  { %470 = vmatpush3.bf16.msra.mxu0 %v469_v28 }
   0xd   :  { %461 = vmatpush3.bf16.msra.mxu1 %v460_v14  ;;  %445 = vmatprep.subr.mxu0 %v476_v3 }
   0xe   :  { %462 = vmatprep.subr.bf16.mxu1 %v474_v0 }
  0x11   :  { %464 = vmatpush3.bf16.msra.mxu1 %v463_v17 }
  0xda   :  { %v112_v22 = vpop.f32.mrb[0].mxu0 }
  0xdb   :  { %v113_v23 = vadd.f32 %v381_v21, %v112_v22  ;;  %v414_v24 = vpop.f32.mrb[1].mxu0 }
  0xdd   :  { %v116_v25 = vmax.f32 %v113_v23, 0.0 }
  0xdf   :  { %432 = vmatmul.mubr.msk.f32.vlgmr.msra.gmra.mrb[0].mxu1 %vm132_vm2, %v116_v25 }
 0x1b2   :  { %v202_v30 = vpop.f32.mrb[0].mxu1 }
 0x1b3   :  { %v203_v31 = vadd.f32 %v383_v29, %v202_v30  ;;  %v433_v32 = vpop.f32.mrb[1].mxu1 }
 0x1b5   :  { %v206_v33 = vmax.f32 %v203_v31, 0.0 }
 0x1b7   :  { %443 = vmatmul.mubr.msk.f32.vlgmr.msra.gmra.mrb[2].mxu0 %vm218_vm3, %v206_v33 }
 0x1b8   :  { %447 = vmatprep.mubr.msk.f32.mxu0 %vm475_vm0, %v476_v3  ;;  %446 = vmatpush3.msra.mxu0 %v293_v34 }
 0x28a   :  { %v288_v36 = vpop.f32.mrb[2].mxu0 }
 0x28b   :  { %v289_v37 = vadd.f32 %v385_v35, %v288_v36  ;;  %v444_v38 = vpop.f32.mrb[3].mxu0 }
 0x28d   :  { %v292_v39 = vmax.f32 %v289_v37, 0.0 }
 0x28f   :  { %448 = vmatmul.mubr.msk.f32.vlgmr.msra.gmra.mrb[4].mxu0 %vm301_vm4, %v292_v39 }
 0x362   :  { %v371_v41 = vpop.f32.mrb[4].mxu0 }
 0x363   :  { %v372_v42 = vadd.f32 %v387_v40, %v371_v41  ;;  %v449_v43 = vpop.f32.mrb[5].mxu0 }
 0x365   :  { %376 = vst.msk [vmem:[%s603_s9] sm:$0xff] %vm375_vm5, %v372_v42 }

</bundles_post_ra>
